<compile_context>
chip_gen: v5e
topology: v5e:2x2
jax: 0.10.0
libtpu: 0.0.40
codegen_flags: <defaults>
</compile_context>

<pallas_src>
import jax
import jax.numpy as jnp
from jax.experimental import pallas as pl
from jax.experimental.pallas import tpu as pltpu


def _model_kernel(x_ref, w1_ref, b1_ref, w2_ref, b2_ref, o_ref):
    # All refs are whole-array VMEM views (gridless pallas_call).
    #   x_ref:  (B, N, N)  original x1; permute(0, 2, 1) is folded algebraically
    #   w1_ref: (N, N)     linear1.weight
    #   b1_ref: (1, N)     linear1.bias
    #   w2_ref: (N, N)     linear2.weight
    #   b2_ref: (1, N)     linear2.bias
    #   o_ref:  (B, N)     flattened (B, 1, N) output
    x = x_ref[...].astype(jnp.float32)
    w1 = w1_ref[...].astype(jnp.float32)
    b1 = b1_ref[...].astype(jnp.float32)
    w2 = w2_ref[...].astype(jnp.float32)
    b2 = b2_ref[...].astype(jnp.float32)

    # In-kernel algebraic fold (exact in real arithmetic; ~1-ulp f32 reassociation):
    #   mean over the output features of linear1 commutes with the matmul.
    w_eff = jnp.mean(w1, axis=0, keepdims=True)          # (1, N): column means of W1
    b1_mean = jnp.mean(b1, keepdims=True)                # (1, 1): mean(b1)

    # r[b, i] = sum_j w_eff[j] * x1[b, j, i]
    #   == (permute(0,2,1) -> linear1 -> mean(dim=-1)) minus the constant mean(b1) term.
    # Weighted sublane reduction on VPU/XLU; no MXU for a 2x2 contraction.
    r = jnp.sum(x * w_eff[:, :, None], axis=1)           # (B, N)

    # out[b, m] = sum_i r[b, i] * W2[m, i] + mean(b1) * sum_i W2[m, i] + b2[m]
    if r.shape[-1] >= 128:
        # Large-N path (future-proofing only): contraction on the MXU.
        out = jnp.dot(r, w2.T, preferred_element_type=jnp.float32)
    else:
        # Tiny-N path: VPU broadcast-multiply + lane reduce.
        out = jnp.sum(r[:, None, :] * w2[None, :, :], axis=-1)   # (B, N)
    out = out + b1_mean * jnp.sum(w2, axis=1)[None, :] + b2      # folded bias

    o_ref[...] = out.astype(o_ref.dtype)


def model_forward(x1, w1, b1, w2, b2):
    B, N, _ = x1.shape
    vmem_spec = pl.BlockSpec(memory_space=pltpu.MemorySpace.VMEM)

    out2d = pl.pallas_call(
        _model_kernel,
        out_shape=jax.ShapeDtypeStruct((B, N), x1.dtype),
        in_specs=[vmem_spec] * 5,
        out_specs=vmem_spec,
    )(x1, w1, b1.reshape(1, N), w2, b2.reshape(1, N))

    # (B, N) -> (B, 1, N): free wrapper-side reshape to the module's output shape.
    return out2d.reshape(B, 1, N)


def reference_forward(x1, w1, b1, w2, b2):
    # Pure-JAX reference with the same (keepdim) interpretation.
    v1 = jnp.transpose(x1, (0, 2, 1))                    # (B, N, N)
    v2 = jnp.einsum("bij,kj->bik", v1, w1) + b1          # (B, N, N)
    x3 = jnp.mean(v2, axis=-1, keepdims=True)            # (B, N, 1)
    v3 = jnp.transpose(x3, (0, 2, 1))                    # (B, 1, N)
    v4 = jnp.einsum("bij,kj->bik", v3, w2) + b2          # (B, 1, N)
    return v4


if __name__ == "__main__":
    key = jax.random.PRNGKey(0)
    k_x, k_w1, k_b1, k_w2, k_b2 = jax.random.split(key, 5)

    B, N = 2, 2  # Linear(2, 2) fixes N = 2; batch kept small like the module's (1, 2, 2)
    x1 = jax.random.normal(k_x, (B, N, N), dtype=jnp.float32)

    # torch.nn.Linear-style deterministic init: U(-1/sqrt(in), 1/sqrt(in))
    bound = 1.0 / jnp.sqrt(jnp.float32(N))
    w1 = jax.random.uniform(k_w1, (N, N), jnp.float32, -bound, bound)
    b1 = jax.random.uniform(k_b1, (N,), jnp.float32, -bound, bound)
    w2 = jax.random.uniform(k_w2, (N, N), jnp.float32, -bound, bound)
    b2 = jax.random.uniform(k_b2, (N,), jnp.float32, -bound, bound)

    out = model_forward(x1, w1, b1, w2, b2)
    out = jax.block_until_ready(out)

    ref = reference_forward(x1, w1, b1, w2, b2)
    assert out.shape == (B, 1, N), out.shape
    assert jnp.allclose(out, ref, atol=1e-5, rtol=1e-5), (out, ref)

    print("KERNEL_OK")
</pallas_src>

<mosaic_0001>
module attributes {stable_mosaic.version = 11 : i64} {
  func.func @_model_kernel(%arg0: memref<2x2x2xf32, #tpu.memory_space<vmem>>, %arg1: memref<2x2xf32, #tpu.memory_space<vmem>>, %arg2: memref<1x2xf32, #tpu.memory_space<vmem>>, %arg3: memref<2x2xf32, #tpu.memory_space<vmem>>, %arg4: memref<1x2xf32, #tpu.memory_space<vmem>>, %arg5: memref<2x2xf32, #tpu.memory_space<vmem>>) attributes {dimension_semantics = [], scalar_prefetch = 0 : i64, scratch_operands = 0 : i64, tpu.core_type = #tpu.core_type<tc>} {
    %c0 = arith.constant 0 : index
    %c0_0 = arith.constant 0 : index
    %c0_1 = arith.constant 0 : index
    %0 = vector.load %arg0[%c0, %c0_0, %c0_1] : memref<2x2x2xf32, #tpu.memory_space<vmem>>, vector<2x2x2xf32>
    %c0_2 = arith.constant 0 : index
    %c0_3 = arith.constant 0 : index
    %1 = vector.load %arg1[%c0_2, %c0_3] : memref<2x2xf32, #tpu.memory_space<vmem>>, vector<2x2xf32>
    %c0_4 = arith.constant 0 : index
    %c0_5 = arith.constant 0 : index
    %2 = vector.load %arg2[%c0_4, %c0_5] : memref<1x2xf32, #tpu.memory_space<vmem>>, vector<1x2xf32>
    %c0_6 = arith.constant 0 : index
    %c0_7 = arith.constant 0 : index
    %3 = vector.load %arg3[%c0_6, %c0_7] : memref<2x2xf32, #tpu.memory_space<vmem>>, vector<2x2xf32>
    %c0_8 = arith.constant 0 : index
    %c0_9 = arith.constant 0 : index
    %4 = vector.load %arg4[%c0_8, %c0_9] : memref<1x2xf32, #tpu.memory_space<vmem>>, vector<1x2xf32>
    %cst = arith.constant dense<0.000000e+00> : vector<2xf32>
    %5 = vector.multi_reduction <add>, %1, %cst [0] : vector<2x2xf32> to vector<2xf32>
    %6 = vector.shape_cast %5 : vector<2xf32> to vector<1x2xf32>
    %cst_10 = arith.constant 2.000000e+00 : f32
    %7 = vector.broadcast %cst_10 : f32 to vector<1x2xf32>
    %8 = arith.divf %6, %7 : vector<1x2xf32>
    %9 = vector.shape_cast %2 : vector<1x2xf32> to vector<1x1x2xf32>
    %cst_11 = arith.constant dense<0.000000e+00> : vector<1xf32>
    %10 = vector.multi_reduction <add>, %9, %cst_11 [1, 2] : vector<1x1x2xf32> to vector<1xf32>
    %11 = vector.shape_cast %10 : vector<1xf32> to vector<1x1x1xf32>
    %12 = vector.extract %11[0, 0, 0] : f32 from vector<1x1x1xf32>
    %13 = vector.broadcast %12 : f32 to vector<1x1xf32>
    %cst_12 = arith.constant 2.000000e+00 : f32
    %14 = vector.broadcast %cst_12 : f32 to vector<1x1xf32>
    %15 = arith.divf %13, %14 : vector<1x1xf32>
    %16 = vector.shape_cast %8 : vector<1x2xf32> to vector<1x2x1xf32>
    %17 = vector.broadcast %16 : vector<1x2x1xf32> to vector<2x2x2xf32>
    %18 = arith.mulf %0, %17 : vector<2x2x2xf32>
    %cst_13 = arith.constant dense<0.000000e+00> : vector<2x2xf32>
    %19 = vector.multi_reduction <add>, %18, %cst_13 [1] : vector<2x2x2xf32> to vector<2x2xf32>
    %20 = vector.shape_cast %19 : vector<2x2xf32> to vector<2x1x2xf32>
    %21 = vector.shape_cast %3 : vector<2x2xf32> to vector<1x2x2xf32>
    %22 = vector.broadcast %20 : vector<2x1x2xf32> to vector<2x2x2xf32>
    %23 = vector.broadcast %21 : vector<1x2x2xf32> to vector<2x2x2xf32>
    %24 = arith.mulf %22, %23 : vector<2x2x2xf32>
    %cst_14 = arith.constant dense<0.000000e+00> : vector<2x2xf32>
    %25 = vector.multi_reduction <add>, %24, %cst_14 [2] : vector<2x2x2xf32> to vector<2x2xf32>
    %cst_15 = arith.constant dense<0.000000e+00> : vector<2xf32>
    %26 = vector.multi_reduction <add>, %3, %cst_15 [1] : vector<2x2xf32> to vector<2xf32>
    %27 = vector.shape_cast %26 : vector<2xf32> to vector<1x2xf32>
    %28 = vector.broadcast %15 : vector<1x1xf32> to vector<1x2xf32>
    %29 = arith.mulf %28, %27 : vector<1x2xf32>
    %30 = vector.broadcast %29 : vector<1x2xf32> to vector<2x2xf32>
    %31 = arith.addf %25, %30 : vector<2x2xf32>
    %32 = vector.broadcast %4 : vector<1x2xf32> to vector<2x2xf32>
    %33 = arith.addf %31, %32 : vector<2x2xf32>
    %c0_16 = arith.constant 0 : index
    %c0_17 = arith.constant 0 : index
    %34 = vector.load %arg5[%c0_16, %c0_17] : memref<2x2xf32, #tpu.memory_space<vmem>>, vector<2x2xf32>
    tpu.vector_store %arg5[%c0_16, %c0_17], %33 {strides = array<i32>} : memref<2x2xf32, #tpu.memory_space<vmem>>, vector<2x2xf32>,
    return
  }
}

</mosaic_0001>

<bundles_post_ra>
// kernel: tpu_custom_call.1
= control target key start
LH: loop header
LB: loop body
LE: loop exit
PB: predicated region body
PF: predicated region fallthrough
CT: control target
= control target key end

     0   :  { %10 = vsyncpa [#allocation3], 0  ;;  %s365_s0 = inlined_call_operand.hbm [shape: f32[2,2,2], index: 0, kind: input, shape index: {}]   ;;  %s366_s1 = inlined_call_operand.hbm [shape: f32[2,2], index: 1, kind: input, shape index: {}]   ;;  %s367_s2 = inlined_call_operand.hbm [shape: f32[1,2], index: 2, kind: input, shape index: {}]   ;;  %s368_s3 = inlined_call_operand.vmem [shape: f32[2,2], index: 3, kind: input, shape index: {}]   ;;  %s369_s4 = inlined_call_operand.vmem [shape: f32[1,2], index: 4, kind: input, shape index: {}]   ;;  %s370_s5 = inlined_call_operand.hbm [shape: f32[2,2], index: 5, kind: output, shape index: {}]  }
   0x1   :  { %11 = vsyncpa [#allocation6], 0  ;;  %s31_s20 = sshll.u32 %s366_s1, 4  ;;  %s32_s20 = int_to_ptr.hbm [resolvable:$true] %s31_s20 }
   0x2   :  { %12 = vsyncpa [#allocation4], 0  ;;  %s300_s21 = smov [#allocation5]   ;;  %s17_s25 = sshll.u32 %s365_s0, 4  ;;  %s18_s25 = int_to_ptr.hbm [resolvable:$true] %s17_s25 }
   0x3   :  { %s33_s22 = sshll.u32 %s300_s21, 4  ;;  %s301_s26 = smov [#allocation2]   ;;  %s34_s22 = int_to_ptr.vmem [resolvable:$true] %s33_s22 }
   0x4   :  { %36 = dma.hbm_to_vmem [thread:$0]  %s32_s20, 32, %s34_s22, [#allocation6]  }
   0x5   :  { %s19_s27 = sshll.u32 %s301_s26, 4  ;;  %s302_s28 = smov 32   ;;  %s20_s27 = int_to_ptr.vmem [resolvable:$true] %s19_s27 }
   0x6   :  { %s303_s29 = smov 2   ;;  %s42_s1 = sshll.u32 %s367_s2, 4  ;;  %s43_s1 = int_to_ptr.hbm [resolvable:$true] %s42_s1 }
   0x7   :  { %25 = dma.hbm_to_vmem [thread:$0]  %s18_s25, 64, %s20_s27, [#allocation3], %s302_s28, %s302_s28, %s303_s29  }
   0x8   :  { %s304_s7 = smov [#allocation7]  }
   0x9   :  { %s44_s8 = sshll.u32 %s304_s7, 4  ;;  %s45_s8 = int_to_ptr.vmem [resolvable:$true] %s44_s8 }
   0xa   :  { %47 = dma.hbm_to_vmem [thread:$0]  %s43_s1, 16, %s45_s8, [#allocation6]  }
   0xb   :  { %294 = dma.done.wait [#allocation3], 64  }
   0xc   :  { %295 = vsyncadd [#allocation3], 4294967232 }
   0xd   :  { %296 = dma.done.wait [#allocation6], 48  }
   0xe   :  { %297 = vsyncadd [#allocation6], 4294967248  ;;  %v99_v0 = vlaneseq  ;;  %v305_v1 = vmov 2.0   ;;  %vm86_vm0 = vcmask 8192   ;;  %vm70_vm1 = vcmask 9216   ;;  %s169_s14 = sshll.u32 %s370_s5, 4  ;;  %s170_s14 = int_to_ptr.hbm [resolvable:$true] %s169_s14 }
   0xf   :  { %196 = vrcp.f32 %v305_v1  ;;  %v67_v4 = vld [vmem:[#allocation7] sm:$0x1]  ;;  %v66_v5 = vld [vmem:[#allocation5] sm:$0x3]  ;;  %v68_v6 = vld [vmem:[%s368_s3] sm:$0x3] }
  0x10   :  { %v100_v2 = vshrl.u32 %v99_v0, 7  ;;  %v87_v7 = vsel %vm86_vm0, %v67_v4, 0.0  ;;  %v71_v8 = vsel %vm70_vm1, %v66_v5, 0.0  ;;  %v129_v11 = vsel %vm70_vm1, %v68_v6, 0.0  ;;  %v64_v29 = vld [vmem:[#allocation2] sm:$0x3] }
  0x11   :  { %88 = vadd.xlane.f32.xlu0 %v87_v7  ;;  %v72_v10 = vrot.slane %v71_v8, 4  ;;  %130 = vadd.xlane.f32.xlu1 %v129_v11  ;;  %v65_v30 = vld [vmem:[#allocation2 + $0x2] sm:$0x3]  ;;  %v195_v52 = vld [vmem:[%s369_s4] ss:$0 sm:$0xff]  ;;  %v306_v53 = vmov 0  }
  0x12   :  { %190 = vset.pattern.permute.xlu0 %v100_v2  ;;  %191 = vset.pattern.permute.xlu2 %v100_v2  ;;  %v155_v2 = vand.u32 127, %v99_v0  ;;  %s307_s4 = smov [#allocation8]   ;;  %vm158_vm3 = vcmask 1041409  }
  0x13   :  { %v73_v13 = vadd.f32 %v72_v10, %v71_v8  ;;  %192 = vset.pattern.permute.xlu1 %v306_v53  ;;  %s167_s11 = sshll.u32 %s307_s4, 4  ;;  %s168_s11 = int_to_ptr.vmem [resolvable:$true] %s167_s11 }
  0x15   :  { %v197_v3 = vpop.eup %196  ;;  %v74_v14 = vrot.slane %v73_v13, 2 }
  0x16   :  { %v79_v9 = vmul.f32 2.0, %v197_v3  ;;  %vm83_vm2 = vweird.f32 %v197_v3 }
  0x17   :  { %v75_v16 = vadd.f32 %v74_v14, %v73_v13 }
  0x18   :  { %v80_v12 = vsub.f32 1.0, %v79_v9 }
  0x19   :  { %v76_v17 = vrot.slane %v75_v16, 1 }
  0x1a   :  { %v81_v15 = vmul.f32 %v197_v3, %v80_v12 }
  0x1b   :  { %v77_v19 = vadd.f32 %v76_v17, %v75_v16 }
  0x1c   :  { %v82_v18 = vadd.f32 %v197_v3, %v81_v15 }
  0x1e   :  { %v84_v20 = vsel %vm83_vm2, %v197_v3, %v82_v18 }
  0x1f   :  { %v85_v21 = vmul.f32 %v84_v20, %v77_v19 }
  0x25   :  { %103 = vperm.xlu0 %190, %v85_v21  }
  0x2d   :  { %194 = vset.pattern.permute.xlu0 %v306_v53 }
  0x84   :  { %v89_v22 = vpop.xlane.xlu0 %88  ;;  %v131_v54 = vpop.xlane.xlu1 %130 }
  0x85   :  { %v90_v23 = vrot.slane %v89_v22, 4 }
  0x87   :  { %v91_v24 = vadd.f32 %v90_v23, %v89_v22 }
  0x89   :  { %v92_v25 = vrot.slane %v91_v24, 2 }
  0x8b   :  { %v93_v26 = vadd.f32 %v92_v25, %v91_v24 }
  0x8d   :  { %v94_v27 = vrot.slane %v93_v26, 1 }
  0x8f   :  { %v95_v28 = vadd.f32 %v94_v27, %v93_v26 }
  0x91   :  { %180 = vpush %v95_v28 }
  0x97   :  { %v104_v31 = vpop.permute.xlu0 %103 }
  0x98   :  { %v105_v32 = vmul.f32 %v104_v31, %v64_v29  ;;  %v106_v33 = vmul.f32 %v104_v31, %v65_v30 }
  0x9a   :  { %v107_v34 = vsel %vm70_vm1, %v105_v32, 0.0  ;;  %v114_v35 = vsel %vm70_vm1, %v106_v33, 0.0 }
  0x9b   :  { %v108_v36 = vrot.slane %v107_v34, 4  ;;  %v115_v37 = vrot.slane %v114_v35, 4 }
  0x9d   :  { %v109_v38 = vadd.f32 %v108_v36, %v107_v34  ;;  %v116_v39 = vadd.f32 %v115_v37, %v114_v35 }
  0x9f   :  { %v110_v40 = vrot.slane %v109_v38, 2  ;;  %v117_v41 = vrot.slane %v116_v39, 2 }
  0xa1   :  { %v111_v42 = vadd.f32 %v110_v40, %v109_v38  ;;  %v118_v43 = vadd.f32 %v117_v41, %v116_v39 }
  0xa3   :  { %v119_v44 = vrot.slane %v118_v43, 1  ;;  %v112_v45 = vrot.slane %v111_v42, 1 }
  0xa5   :  { %v120_v46 = vadd.f32 %v119_v44, %v118_v43  ;;  %v113_v47 = vadd.f32 %v112_v45, %v111_v42 }
  0xa7   :  { %v122_v48 = vmul.f32 %v120_v46, %v68_v6  ;;  %v121_v49 = vmul.f32 %v113_v47, %v68_v6 }
  0xa9   :  { %v126_v50 = vsel %vm70_vm1, %v122_v48, 0.0  ;;  %v123_v51 = vsel %vm70_vm1, %v121_v49, 0.0 }
  0xaa   :  { %127 = vadd.xlane.f32.xlu2 %v126_v50  ;;  %124 = vadd.xlane.f32.xlu1 %v123_v51 }
  0xc2   :  { %141 = vperm.xlu2 %191, %v195_v52   ;;  %s181_s10 = spop %180 }
  0xc3   :  { %v97_v55 = vstv %s181_s10 }
  0xc4   :  { %v98_v57 = vmul.f32 %v97_v55, %v84_v20 }
  0xc6   :  { %v132_v59 = vmul.f32 %v131_v54, %v98_v57 }
  0xca   :  { %193 = vset.pattern.permute.xlu2 %v306_v53 }
 0x11d   :  { %v128_v56 = vpop.xlane.xlu2 %127  ;;  %v125_v58 = vpop.xlane.xlu1 %124 }
 0x11e   :  { %v134_v60 = vadd.f32 %v132_v59, %v128_v56  ;;  %v133_v61 = vadd.f32 %v132_v59, %v125_v58 }
 0x125   :  { %v142_v62 = vpop.permute.xlu2 %141 }
 0x126   :  { %v144_v63 = vadd.f32 %v142_v62, %v133_v61  ;;  %v145_v1 = vadd.f32 %v142_v62, %v134_v60 }
 0x128   :  { %152 = vperm.xlu2 %193, %v145_v1   ;;  %149 = vperm.xlu1 %192, %v144_v63  }
 0x182   :  { %v153_v3 = vpop.permute.xlu2 %152 }
 0x183   :  { %v157_v5 = vperm.slane %v153_v3, %v155_v2 }
 0x19a   :  { %v150_v4 = vpop.permute.xlu1 %149 }
 0x19b   :  { %v156_v6 = vperm.slane %v150_v4, %v155_v2 }
 0x19d   :  { %v159_v7 = vsel %vm158_vm3, %v157_v5, %v156_v6 }
 0x19e   :  { %161 = vst.msk [vmem:[#allocation8] sm:$0x3] %vm70_vm1, %v159_v7 }
 0x19f   :  { %172 = dma.vmem_to_hbm [thread:$0]  %s168_s11, 32, %s170_s14, [#allocation4]  }
 0x1a0   :  { %298 = dma.done.wait [#allocation4], 32  }
 0x1a1   :  { %299 = vsyncadd [#allocation4], 4294967264 }
 0x1a2   :  { %177 = vsyncpa [#allocation3], 1 }
 0x1a3   :  { %178 = vsyncpa [#allocation6], 1 }
 0x1a4   :  { %179 = vsyncpa [#allocation4], 1 }

</bundles_post_ra>
